<compile_context>
chip_gen: v6e
topology: v6e:2x2x1
jax: 0.10.0
libtpu: 0.0.40
codegen_flags: <defaults>
</compile_context>

<pallas_src>
import jax
import jax.numpy as jnp
import numpy as np
from jax.experimental import pallas as pl
from jax.experimental.pallas import tpu as pltpu

LANE = 128


def _round_up(n, m):
    return ((n + m - 1) // m) * m


# --------------------------- Pallas kernels ---------------------------------

def sage_layer1_kernel(a_ref, x_full_ref, x_row_ref, w1_ref, b1_ref, h_ref):
    """Row tile of layer 1:  h = relu([A_rows @ x, x_rows] @ [Wl1; Wr1] + b1)."""
    # bf16 x bf16 -> f32 accumulate on the MXU
    agg = jnp.dot(a_ref[...], x_full_ref[...],
                  preferred_element_type=jnp.float32)          # (TN, F_pad) f32
    cat = jnp.concatenate([agg.astype(jnp.bfloat16), x_row_ref[...]], axis=1)
    h = jnp.dot(cat, w1_ref[...],
                preferred_element_type=jnp.float32) + b1_ref[...]
    h = jnp.maximum(h, 0.0)                                    # relu in f32
    h_ref[...] = h.astype(h_ref.dtype)                         # store bf16 for pass 2


def sage_layer2_kernel(a_ref, h_full_ref, h_row_ref, w2_ref, b2_ref, o_ref):
    """Row tile of layer 2:  y = [A_rows @ h, h_rows] @ [Wl2; Wr2] + b2."""
    agg = jnp.dot(a_ref[...], h_full_ref[...],
                  preferred_element_type=jnp.float32)
    cat = jnp.concatenate([agg.astype(jnp.bfloat16), h_row_ref[...]], axis=1)
    y = jnp.dot(cat, w2_ref[...],
                preferred_element_type=jnp.float32) + b2_ref[...]
    o_ref[...] = y.astype(o_ref.dtype)


def _sage_layer(kernel, a_bf16, feat_bf16, w_bf16, b_f32, out_dtype, row_tile):
    """One SAGE layer as a row-tiled pallas_call.

    A is streamed in (row_tile, N_pad) blocks; the full feature matrix, the
    fused weight stack and the bias use a constant index_map so they stay
    VMEM-resident across the whole grid.
    """
    n_pad = a_bf16.shape[0]
    f_pad = feat_bf16.shape[1]
    o_pad = w_bf16.shape[1]
    grid = (n_pad // row_tile,)
    return pl.pallas_call(
        kernel,
        out_shape=jax.ShapeDtypeStruct((n_pad, o_pad), out_dtype),
        grid_spec=pltpu.PrefetchScalarGridSpec(
            num_scalar_prefetch=0,
            grid=grid,
            in_specs=[
                pl.BlockSpec((row_tile, n_pad), lambda i: (i, 0)),  # A row tile (streamed)
                pl.BlockSpec((n_pad, f_pad), lambda i: (0, 0)),     # full features (resident)
                pl.BlockSpec((row_tile, f_pad), lambda i: (i, 0)),  # feature rows (self term)
                pl.BlockSpec(w_bf16.shape, lambda i: (0, 0)),       # fused [W_l; W_r] (resident)
                pl.BlockSpec(b_f32.shape, lambda i: (0, 0)),        # bias (resident)
            ],
            out_specs=pl.BlockSpec((row_tile, o_pad), lambda i: (i, 0)),
        ),
        compiler_params=pltpu.CompilerParams(
            dimension_semantics=("parallel",)),
    )(a_bf16, feat_bf16, feat_bf16, w_bf16, b_f32)


# ----------------------------- wrapper ---------------------------------------

def gcn_forward(A, x, params, *, row_tile=128):
    """Full 2-layer GCN forward. A: (N, N) f32, x: (N, in_c) f32."""
    wl1, bl1, wr1, wl2, bl2, wr2 = params
    N = x.shape[0]
    in_c, hid_c = wl1.shape
    out_c = wl2.shape[1]

    n_pad = _round_up(max(N, row_tile), row_tile)
    f_pad = _round_up(in_c, LANE)
    h_pad = _round_up(hid_c, LANE)
    o_pad = _round_up(out_c, LANE)

    # zero-pad + cast MXU operands to bf16 (f32 accumulation stays in-kernel)
    A_p = jnp.zeros((n_pad, n_pad), jnp.float32).at[:N, :N].set(A).astype(jnp.bfloat16)
    x_p = jnp.zeros((n_pad, f_pad), jnp.float32).at[:N, :in_c].set(x).astype(jnp.bfloat16)

    # fuse (agg @ W_l + x @ W_r) into a single matmul: [agg, x] @ [[W_l],[W_r]]
    w1 = (jnp.zeros((2 * f_pad, h_pad), jnp.float32)
          .at[:in_c, :hid_c].set(wl1)
          .at[f_pad:f_pad + in_c, :hid_c].set(wr1)).astype(jnp.bfloat16)
    b1 = jnp.zeros((1, h_pad), jnp.float32).at[:, :hid_c].set(bl1)

    w2 = (jnp.zeros((2 * h_pad, o_pad), jnp.float32)
          .at[:hid_c, :out_c].set(wl2)
          .at[h_pad:h_pad + hid_c, :out_c].set(wr2)).astype(jnp.bfloat16)
    b2 = jnp.zeros((1, o_pad), jnp.float32).at[:, :out_c].set(bl2)

    # pass 1: hidden h (bf16, lane-padded); pass 2: output, consuming resident h
    h = _sage_layer(sage_layer1_kernel, A_p, x_p, w1, b1, jnp.bfloat16, row_tile)
    y = _sage_layer(sage_layer2_kernel, A_p, h, w2, b2, jnp.float32, row_tile)
    return y[:N, :out_c]


# ------------------------- plain-JAX glue / reference ------------------------

def build_mean_adjacency(edge_index, num_nodes):
    """Dense row-normalized adjacency for mean aggregation."""
    src, dst = edge_index[0], edge_index[1]
    ones = jnp.ones(src.shape[0], dtype=jnp.float32)
    deg = jnp.zeros((num_nodes,), jnp.float32).at[dst].add(ones)          # in-degree
    A = jnp.zeros((num_nodes, num_nodes), jnp.float32).at[dst, src].add(ones)
    A = A / jnp.maximum(deg, 1.0)[:, None]                                # isolated nodes -> 0
    return A


def init_params(key, in_c, hidden_c, out_c):
    """Deterministic glorot-ish init; weights stored (in, out) so matmul is x @ W."""
    ks = jax.random.split(key, 4)

    def glorot(k, fan_in, fan_out):
        lim = jnp.sqrt(6.0 / (fan_in + fan_out))
        return jax.random.uniform(k, (fan_in, fan_out), jnp.float32, -lim, lim)

    wl1 = glorot(ks[0], in_c, hidden_c)
    bl1 = jnp.zeros((1, hidden_c), jnp.float32)
    wr1 = glorot(ks[1], in_c, hidden_c)
    wl2 = glorot(ks[2], hidden_c, out_c)
    bl2 = jnp.zeros((1, out_c), jnp.float32)
    wr2 = glorot(ks[3], hidden_c, out_c)
    return (wl1, bl1, wr1, wl2, bl2, wr2)


def reference_forward(A, x, params):
    """Pure-JAX reference with matching bf16-input / f32-accumulate matmuls."""
    wl1, bl1, wr1, wl2, bl2, wr2 = params

    def mm(p, q):
        return jnp.dot(p.astype(jnp.bfloat16), q.astype(jnp.bfloat16),
                       preferred_element_type=jnp.float32)

    h = jnp.maximum(mm(mm(A, x), wl1) + bl1 + mm(x, wr1), 0.0)
    return mm(mm(A, h), wl2) + bl2 + mm(h, wr2)


if __name__ == "__main__":
    # in_channels = 20 is fixed by SAGEConv(20, ...); hidden must be 20 for conv2.
    N, E = 200, 800
    IN_C, HIDDEN_C, OUT_C = 20, 20, 8

    key = jax.random.PRNGKey(0)
    k_x, k_e, k_p = jax.random.split(key, 3)

    x = jax.random.normal(k_x, (N, IN_C), jnp.float32)
    edge_index = jax.random.randint(k_e, (2, E), 0, N, dtype=jnp.int32)

    A = build_mean_adjacency(edge_index, N)
    params = init_params(k_p, IN_C, HIDDEN_C, OUT_C)

    y = gcn_forward(A, x, params)
    y = jax.block_until_ready(y)

    y_ref = reference_forward(A, x, params)
    np.testing.assert_allclose(np.asarray(y), np.asarray(y_ref), rtol=5e-3, atol=5e-3)

    print("KERNEL_OK")
</pallas_src>

<mosaic_0001>
module attributes {stable_mosaic.version = 11 : i64} {
  func.func @sage_layer1_kernel(%arg0: i32, %arg1: memref<128x256xbf16, #tpu.memory_space<vmem>>, %arg2: memref<256x128xbf16, #tpu.memory_space<vmem>>, %arg3: memref<128x128xbf16, #tpu.memory_space<vmem>>, %arg4: memref<256x128xbf16, #tpu.memory_space<vmem>>, %arg5: memref<1x128xf32, #tpu.memory_space<vmem>>, %arg6: memref<128x128xbf16, #tpu.memory_space<vmem>>) attributes {dimension_semantics = [#tpu.dimension_semantics<parallel>], iteration_bounds = array<i64: 2>, scalar_prefetch = 0 : i64, scratch_operands = 0 : i64, tpu.core_type = #tpu.core_type<tc>, window_params = [{transform_indices = @transform_0, window_bounds = array<i64: 128, 256>}, {pipeline_mode = #tpu.pipeline_mode<synchronous>, transform_indices = @transform_1, window_bounds = array<i64: 256, 128>}, {transform_indices = @transform_2, window_bounds = array<i64: 128, 128>}, {pipeline_mode = #tpu.pipeline_mode<synchronous>, transform_indices = @transform_3, window_bounds = array<i64: 256, 128>}, {pipeline_mode = #tpu.pipeline_mode<synchronous>, transform_indices = @transform_4, window_bounds = array<i64: 1, 128>}, {transform_indices = @transform_5, window_bounds = array<i64: 128, 128>}]} {
    %c0 = arith.constant 0 : index
    %c0_0 = arith.constant 0 : index
    %0 = vector.load %arg1[%c0, %c0_0] : memref<128x256xbf16, #tpu.memory_space<vmem>>, vector<128x256xbf16>
    %c0_1 = arith.constant 0 : index
    %c0_2 = arith.constant 0 : index
    %1 = vector.load %arg2[%c0_1, %c0_2] : memref<256x128xbf16, #tpu.memory_space<vmem>>, vector<256x128xbf16>
    %cst = arith.constant dense<0.000000e+00> : vector<128x128xf32>
    %2 = tpu.matmul %0, %1, %cst {dimension_numbers = #tpu.dot_dimension_numbers<[1], [0], [0], [1], [0, 0, 1, 1], [], []>} : vector<128x256xbf16>, vector<256x128xbf16>, vector<128x128xf32> -> vector<128x128xf32>
    %3 = arith.truncf %2 : vector<128x128xf32> to vector<128x128xbf16>
    %c0_3 = arith.constant 0 : index
    %c0_4 = arith.constant 0 : index
    %4 = vector.load %arg3[%c0_3, %c0_4] : memref<128x128xbf16, #tpu.memory_space<vmem>>, vector<128x128xbf16>
    %5 = tpu.concatenate %3, %4 in 1 : vector<128x128xbf16>, vector<128x128xbf16> -> vector<128x256xbf16>
    %c0_5 = arith.constant 0 : index
    %c0_6 = arith.constant 0 : index
    %6 = vector.load %arg4[%c0_5, %c0_6] : memref<256x128xbf16, #tpu.memory_space<vmem>>, vector<256x128xbf16>
    %cst_7 = arith.constant dense<0.000000e+00> : vector<128x128xf32>
    %7 = tpu.matmul %5, %6, %cst_7 {dimension_numbers = #tpu.dot_dimension_numbers<[1], [0], [0], [1], [0, 0, 1, 1], [], []>} : vector<128x256xbf16>, vector<256x128xbf16>, vector<128x128xf32> -> vector<128x128xf32>
    %c0_8 = arith.constant 0 : index
    %c0_9 = arith.constant 0 : index
    %8 = vector.load %arg5[%c0_8, %c0_9] : memref<1x128xf32, #tpu.memory_space<vmem>>, vector<1x128xf32>
    %9 = vector.broadcast %8 : vector<1x128xf32> to vector<128x128xf32>
    %10 = arith.addf %7, %9 : vector<128x128xf32>
    %cst_10 = arith.constant 0.000000e+00 : f32
    %11 = vector.broadcast %cst_10 : f32 to vector<128x128xf32>
    %12 = arith.maximumf %10, %11 : vector<128x128xf32>
    %13 = arith.truncf %12 : vector<128x128xf32> to vector<128x128xbf16>
    %c0_11 = arith.constant 0 : index
    %c0_12 = arith.constant 0 : index
    %14 = vector.load %arg6[%c0_11, %c0_12] : memref<128x128xbf16, #tpu.memory_space<vmem>>, vector<128x128xbf16>
    tpu.vector_store %arg6[%c0_11, %c0_12], %13 {strides = array<i32>} : memref<128x128xbf16, #tpu.memory_space<vmem>>, vector<128x128xbf16>,
    return
  }
  func.func @transform_0(%arg0: i32) -> (i32, i32) {
    %c0_i32 = arith.constant 0 : i32
    %c0_i32_0 = arith.constant 0 : i32
    return %arg0, %c0_i32 : i32, i32
  }
  func.func @transform_1(%arg0: i32) -> (i32, i32) {
    %c0_i32 = arith.constant 0 : i32
    %c0_i32_0 = arith.constant 0 : i32
    %c0_i32_1 = arith.constant 0 : i32
    return %c0_i32, %c0_i32_0 : i32, i32
  }
  func.func @transform_2(%arg0: i32) -> (i32, i32) {
    %c0_i32 = arith.constant 0 : i32
    %c0_i32_0 = arith.constant 0 : i32
    return %arg0, %c0_i32 : i32, i32
  }
  func.func @transform_3(%arg0: i32) -> (i32, i32) {
    %c0_i32 = arith.constant 0 : i32
    %c0_i32_0 = arith.constant 0 : i32
    %c0_i32_1 = arith.constant 0 : i32
    return %c0_i32, %c0_i32_0 : i32, i32
  }
  func.func @transform_4(%arg0: i32) -> (i32, i32) {
    %c0_i32 = arith.constant 0 : i32
    %c0_i32_0 = arith.constant 0 : i32
    %c0_i32_1 = arith.constant 0 : i32
    return %c0_i32, %c0_i32_0 : i32, i32
  }
  func.func @transform_5(%arg0: i32) -> (i32, i32) {
    %c0_i32 = arith.constant 0 : i32
    %c0_i32_0 = arith.constant 0 : i32
    return %arg0, %c0_i32 : i32, i32
  }
}

</mosaic_0001>

<bundles_post_ra>
// kernel: tpu_custom_call.1
= control target key start
LH: loop header
LB: loop body
LE: loop exit
PB: predicated region body
PF: predicated region fallthrough
CT: control target
= control target key end

     0   :  { %s2126_s0 = inlined_call_operand.hbm [shape: bf16[256,256], index: 0, kind: input, shape index: {}]   ;;  %s2127_s1 = inlined_call_operand.hbm [shape: bf16[256,128], index: 1, kind: input, shape index: {}]   ;;  %s2128_s2 = inlined_call_operand.hbm [shape: bf16[256,128], index: 2, kind: input, shape index: {}]   ;;  %s2129_s3 = inlined_call_operand.hbm [shape: bf16[256,128], index: 3, kind: input, shape index: {}]   ;;  %s2130_s4 = inlined_call_operand.vmem [shape: f32[1,128], index: 4, kind: input, shape index: {}]   ;;  %s2131_s5 = inlined_call_operand.hbm [shape: bf16[256,128], index: 5, kind: output, shape index: {}]  }
   0x1   :  { %2141 = sst [smem:[#allocation15_spill]] %s2126_s0 }
   0x2   :  { %10 = vsyncpa [#allocation3], 0 }
   0x3   :  { %12 = vsyncpa [#allocation3 + $0x1], 0 }
   0x4   :  { %13 = vsyncpa [#allocation6], 0 }
   0x5   :  { %14 = vsyncpa [#allocation4], 0 }
   0x6   :  { %16 = vsyncpa [#allocation4 + $0x1], 0  ;;  %s1821_s18 = smov 0   ;;  %s1823_s19 = smov 0  }
   0x7   :  { %s1825_s20 = smov 0   ;;  %s1827_s21 = smov 0  }
   0x8 LB: > { %s1842_s22 = sadd.s32 4294967295, %s1778_s21   ;;  %s1161_s23 = sadd.s32 4294967294, %s1778_s21   ;;  %s1778_s21 = sphi %s1827_s21, %s2164_s21   ;;  %s1774_s20 = sphi %s1825_s20, %s2163_s20   ;;  %s1770_s19 = sphi %s1823_s19, %s2162_s19   ;;  %s1766_s18 = sphi %s1821_s18, %s2161_s18  }
   0x9   : > { %p42_p0 = scmp.ne.s32.totalorder %s1770_s19, %s1766_s18  ;;  %p2136_p1 = scmp.eq.s32.totalorder %s1842_s22, 0 }
   0xa   : > { %p155_p2 = scmp.eq.s32.totalorder %s1842_s22, 1  ;;  %p161_p3 = scmp.eq.s32.totalorder %s1161_s23, 1 }
   0xb   : > { %p1851_p4 = por %p2136_p1, %p42_p0  ;;  %p1162_p5 = scmp.ge.s32.totalorder %s1778_s21, 1 }
   0xc   : > { %p1856_p6 = por %p161_p3, %p42_p0  ;;  %p168_p7 = scmp.lt.s32.totalorder %s1778_s21, 3 }
   0xd   : > { %s2142_s24 = scalar_select %p1851_p4, 1, 0 }
   0xe   : > { %s2143_s25 = scalar_select %p1856_p6, 1, 0 }
   0xf   : > { %p1861_p8 = pnand %p1162_p5, %p168_p7  ;;  %s1780_s27 = smov [#allocation5]  }
  0x10   : > { %s180_s28 = sshll.u32 %s1780_s27, 4  ;;  %s1875_s30 = sadd.s32 1, %s1778_s21   ;;  %s181_s28 = int_to_ptr.vmem [resolvable:$true] %s180_s28 }
  0x11   : > { %s2144_s26 = scalar_select %p1861_p8, 1, 0 }
  0x12   : > { %p1466_p9 = pneg %p1861_p8  ;;  %s29_s6 = sadd.s32 1, %s1774_s20 }
  0x13   : > { %s26_s7 = ssub.s32 %s1778_s21, %s1875_s30  ;;  %s1605_s8 = scalar_lea.vmem %s181_s28, 2048 }
  0x14   : > { %p1870_p11 = pnand %p1466_p9, %p2136_p1  ;;  %p1606_p13 = scmp.ne.s32.totalorder %s181_s28, %s1605_s8 }
  0x15   : > { %p1613_p5 = scmp.lt.s32.totalorder %s181_s28, %s181_s28  ;;  %p1614_p7 = scmp.lt.s32.totalorder %s1605_s8, %s1605_s8 }
  0x16   : > { %p2137_p12 = pneg %p1870_p11 }
  0x17   : > { %p1615_p9 = por %p1614_p7, %p1613_p5 }
  0x18   : > { %p1608_p0 = pnand %p1606_p13, %p2137_p12 }
  0x1a   : > { %p1609_p3 = pneg %p1608_p0 }
  0x1c   : > { %p1616_p10 = pnand %p1615_p9, %p1609_p3 }
  0x1e   : > { %1619 = shalt.err (!%p1616_p10)
}
  0x1f   : > { %s2132_s9 = smov 64   ;;  %s2134_s10 = smov 4  }
  0x20   : > { %1469 = dma.hbm_to_vmem [thread:$0]  (!%p1870_p11), %s2127_s1, 2048, %s181_s28, [#allocation6], %s2132_s9, %s2132_s9, %s2134_s10  }
  0x21   : > { %p27_p10 = scmp.eq.s32.totalorder %s26_s7, 0  ;;  %p36_p13 = scmp.ne.s32.totalorder %s1774_s20, %s1770_s19 }
  0x22   : > { %p37_p0 = scmp.eq.s32.totalorder %s1778_s21, 0  ;;  %p1486_p3 = scmp.lt.s32.totalorder %s1778_s21, 2 }
  0x23   : > { %s1898_s13 = scalar_select %p27_p10, %s1774_s20, %s29_s6  }
  0x24   : > { %p38_p5 = por %p37_p0, %p36_p13  ;;  %p1902_p7 = por %p155_p2, %p36_p13 }
  0x25   : > { %s210_s15 = sand.u32 1, %s1778_s21   ;;  %s212_s16 = sand.u32 1, %s1774_s20  }
  0x26   : > { %s2146_s14 = scalar_select %p1902_p7, 1, 0 }
  0x27   : > { %s1166_s17 = sshll.u32 %s212_s16, 7  ;;  %s1258_s23 = sshll.u32 %s1778_s21, 11 }
  0x28   : > { %s2147_s0 = sld [smem:[#allocation15_spill]]  ;;  %s214_s6 = scalar_lea.vmem [#allocation2], %s1166_s17 }
  0x29   : > { %s222_s7 = sshll.u32 %s214_s6, 4  ;;  %p1916_p2 = pnand %p1486_p3, %p38_p5  ;;  %s1914_s7 = int_to_ptr.vmem [resolvable:$true] %s222_s7 }
  0x2a   : > { %s1920_s12 = sshll.u32 %s212_s16, 6  ;;  %s1922_s9 = scalar_lea.sflag [#allocation3], %s210_s15 }
  0x2b   : > { %p1622_p10 = pneg %p1916_p2 }
  0x2e   : > { %s1912_s28 = scalar_lea.hbm %s2147_s0, %s1258_s23  ;;  %s1625_s8 = scalar_lea.hbm %s2147_s0, 4096 }
  0x2f   : > { %s1620_s27 = scalar_lea.hbm %s1912_s28, 2048  ;;  %p1626_p3 = scmp.lt.s32.totalorder %s1912_s28, %s2147_s0 }
  0x30   : > { %p1621_p9 = scmp.ne.s32.totalorder %s1912_s28, %s1620_s27  ;;  %p1627_p5 = scmp.lt.s32.totalorder %s1625_s8, %s1620_s27 }
  0x32   : > { %p1623_p13 = pnand %p1622_p10, %p1621_p9  ;;  %p1628_p1 = por %p1627_p5, %p1626_p3 }
  0x34   : > { %p1624_p0 = pneg %p1623_p13 }
  0x36   : > { %p1629_p12 = pnand %p1628_p1, %p1624_p0 }
  0x38   : > { %1632 = shalt.err (!%p1629_p12)
}
  0x39   : > { %s1633_s15 = scalar_lea.vmem %s1914_s7, 2048  ;;  %s1783_s16 = smov [#allocation2]  }
  0x3a   : > { %p1634_p6 = scmp.ne.s32.totalorder %s1914_s7, %s1633_s15  ;;  %s1638_s17 = sshll.u32 %s1783_s16, 4  ;;  %s1639_s17 = int_to_ptr.vmem [resolvable:$false] %s1638_s17 }
  0x3b   : > { %s1640_s23 = scalar_lea.vmem %s1639_s17, 4096  ;;  %p1641_p7 = scmp.lt.s32.totalorder %s1914_s7, %s1639_s17 }
  0x3c   : > { %p1636_p9 = pnand %p1634_p6, %p1622_p10  ;;  %p1642_p4 = scmp.lt.s32.totalorder %s1640_s23, %s1633_s15 }
  0x3e   : > { %p1637_p13 = pneg %p1636_p9  ;;  %p1643_p8 = por %p1642_p4, %p1641_p7 }
  0x40   : > { %p1644_p3 = pnand %p1643_p8, %p1637_p13 }
  0x42   : > { %1647 = shalt.err (!%p1644_p3)
}
  0x43   : > { %s1784_s10 = smov 128   ;;  %s1785_s27 = smov 8  }
  0x44   : > { %1476 = dma.hbm_to_vmem [thread:$0]  (!%p1916_p2), %s1912_s28, 2048, %s1914_s7, %s1922_s9, %s1784_s10, %s1784_s10, %s1785_s27  }
  0x45   : > { %s236_s8 = scalar_lea.vmem [#allocation7], %s1920_s12  ;;  %s1786_s16 = smov [#allocation8]  }
  0x46   : > { %s243_s6 = sshll.u32 %s236_s8, 4  ;;  %s193_s0 = sshll.u32 %s1786_s16, 4  ;;  %s194_s0 = int_to_ptr.vmem [resolvable:$true] %s193_s0  ;;  %s244_s6 = int_to_ptr.vmem [resolvable:$true] %s243_s6 }
  0x47   : > { %s1259_s15 = sshll.u32 %s1778_s21, 10  ;;  %s1659_s17 = scalar_lea.vmem %s194_s0, 2048 }
  0x48   : > { %p1660_p1 = scmp.ne.s32.totalorder %s194_s0, %s1659_s17  ;;  %p2149_p4 = pneg %p1870_p11 }
  0x49   : > { %p1667_p12 = scmp.lt.s32.totalorder %s194_s0, %s194_s0  ;;  %p1668_p7 = scmp.lt.s32.totalorder %s1659_s17, %s1659_s17 }
  0x4a   : > { %p1662_p6 = pnand %p1660_p1, %p2149_p4 }
  0x4b   : > { %p1669_p0 = por %p1668_p7, %p1667_p12 }
  0x4c   : > { %p1663_p8 = pneg %p1662_p6 }
  0x4e   : > { %p1670_p5 = pnand %p1669_p0, %p1663_p8 }
  0x50   : > { %1673 = shalt.err (!%p1670_p5)
}
  0x51   : > { %s2150_s28 = smov 4   ;;  %s2151_s7 = smov 64  }
  0x52   : > { %1472 = dma.hbm_to_vmem [thread:$0]  (!%p1870_p11), %s2129_s3, 2048, %s194_s0, [#allocation6], %s2151_s7, %s2151_s7, %s2150_s28  }
  0x53   : > { %s1965_s8 = scalar_lea.hbm %s2128_s2, %s1259_s15  ;;  %s1679_s12 = scalar_lea.hbm %s2128_s2, 2048 }
  0x54   : > { %s1674_s16 = scalar_lea.hbm %s1965_s8, 1024  ;;  %p1680_p11 = scmp.lt.s32.totalorder %s1965_s8, %s2128_s2 }
  0x55   : > { %p1675_p9 = scmp.ne.s32.totalorder %s1965_s8, %s1674_s16  ;;  %p1681_p1 = scmp.lt.s32.totalorder %s1679_s12, %s1674_s16 }
  0x57   : > { %p1677_p13 = pnand %p1675_p9, %p1622_p10  ;;  %p1682_p4 = por %p1681_p1, %p1680_p11 }
  0x59   : > { %p1678_p3 = pneg %p1677_p13 }
  0x5b   : > { %p1683_p6 = pnand %p1682_p4, %p1678_p3 }
  0x5d   : > { %1686 = shalt.err (!%p1683_p6)
}
  0x5e   : > { %s1687_s15 = scalar_lea.vmem %s244_s6, 1024  ;;  %s1787_s10 = smov [#allocation7]  }
  0x5f   : > { %p1688_p8 = scmp.ne.s32.totalorder %s244_s6, %s1687_s15  ;;  %s1692_s27 = sshll.u32 %s1787_s10, 4  ;;  %s1693_s27 = int_to_ptr.vmem [resolvable:$false] %s1692_s27 }
  0x60   : > { %s1694_s29 = scalar_lea.vmem %s1693_s27, 2048  ;;  %p1695_p0 = scmp.lt.s32.totalorder %s244_s6, %s1693_s27 }
  0x61   : > { %p1690_p12 = pnand %p1688_p8, %p1622_p10  ;;  %p1696_p5 = scmp.lt.s32.totalorder %s1694_s29, %s1687_s15 }
  0x63   : > { %p1691_p7 = pneg %p1690_p12  ;;  %p1697_p9 = por %p1696_p5, %p1695_p0 }
  0x65   : > { %p1698_p13 = pnand %p1697_p9, %p1691_p7 }
  0x67   : > { %1701 = shalt.err (!%p1698_p13)
}
  0x68   : > { %1479 = dma.hbm_to_vmem [thread:$0]  (!%p1916_p2), %s1965_s8, 1024, %s244_s6, %s1922_s9, %s2151_s7, %s2151_s7, %s2150_s28  }
  0x69   : > { %p2152_p10 = scmp.ne.s32.totalorder %s2144_s26, 0 }
  0x6a   : > { %s257_s16 = sand.u32 (!%p2152_p10), 1, %s1842_s22   ;;  %s1993_s17 = sand.u32 (!%p2152_p10), 1, %s1770_s19  }
  0x6b   : > { %255 = sbr.rel (%p2152_p10) target bundleno = 635 (0x27b), region = 40  ;;  %s1174_s12 = sshll.u32 (!%p2152_p10), %s1993_s17, 7 }
  0x6c   : > { %s258_s0 = scalar_lea.sflag (!%p2152_p10), [#allocation3], %s257_s16  ;;  %s1996_s23 = scalar_lea.vmem (!%p2152_p10), [#allocation2], %s1174_s12 }
  0x6d   : > { %p2153_p3 = scmp.ne.s32.totalorder (!%p2152_p10), %s2142_s24, 0 }
  0x70   : > { %1745 = dma.done.wait (%p2153_p3), %s258_s0, 2048  }
  0x71   : > { %1747 = vsyncadd (%p2153_p3), %s258_s0, 4294965248  ;;  %p2154_p2 = scmp.eq.s32.totalorder %s1842_s22, 0 }
  0x73   : > { %1749 = dma.done.wait (%p2154_p2), [#allocation6], 2048   ;;  %p2155_p11 = pmov %p2154_p2 }
  0x74   : > { %s1176_s26 = sshll.u32 %s1993_s17, 6 }
  0x75   : > { %1751 = vsyncadd (%p2155_p11), [#allocation6], 4294965248  ;;  %s2009_s9 = scalar_lea.vmem [#allocation7], %s1176_s26 }
  0x76   : > { %1753 = dma.done.wait (%p2153_p3), %s258_s0, 1024  }
  0x77   : > { %1755 = vsyncadd (%p2153_p3), %s258_s0, 4294966272  ;;  %p2156_p1 = pmov %p2154_p2 }
  0x79   : > { %1757 = dma.done.wait (%p2156_p1), [#allocation6], 2048   ;;  %p2157_p4 = pmov %p2156_p1 }
  0x7a   : > { %v1530_v0 = vld [vmem:[#allocation5 + $0x78] sm:$0xff]   ;;  %v1532_v2 = vld [vmem:[#allocation5 + $0x70] sm:$0xff]   ;;  %v1534_v4 = vld [vmem:[#allocation5 + $0x68] sm:$0xff]   ;;  %s2052_s6 = scalar_lea.vmem [#allocation9], %s1176_s26  ;;  %s1276_s28 = sshll.u32 %s1842_s22, 10 }
  0x7b   : > { %1759 = vsyncadd (%p2157_p4), [#allocation6], 4294965248  ;;  %v1531_v1 = vld [vmem:[#allocation5 + $0x38] sm:$0xff]   ;;  %1324 = vmatprep.subr.bf16.mxu0 %v1530_v0  ;;  %v1533_v3 = vld [vmem:[#allocation5 + $0x30] sm:$0xff]   ;;  %s1049_s7 = sshll.u32 %s2052_s6, 4  ;;  %s2080_s10 = scalar_lea.hbm %s2131_s5, %s1276_s28  ;;  %s2082_s7 = int_to_ptr.vmem [resolvable:$true] %s1049_s7 }
  0x7c   : > { %1325 = vmatpush3.bf16.msra.mxu0 %v1531_v1  ;;  %v1535_v5 = vld [vmem:[#allocation5 + $0x28] sm:$0xff]   ;;  %v1536_v6 = vld [vmem:[#allocation5 + $0x60] sm:$0xff]   ;;  %v1538_v8 = vld [vmem:[#allocation5 + $0x58] sm:$0xff]   ;;  %s1036_s27 = scalar_lea.sflag [#allocation4], %s1993_s17  ;;  %s1702_s29 = scalar_lea.vmem %s2082_s7, 1024 }
  0x7d   : > { %1326 = vmatprep.subr.bf16.mxu0 %v1532_v2  ;;  %v1537_v7 = vld [vmem:[#allocation5 + $0x20] sm:$0xff]   ;;  %v1539_v9 = vld [vmem:[#allocation5 + $0x18] sm:$0xff]   ;;  %v1540_v10 = vld [vmem:[#allocation5 + $0x50] sm:$0xff]   ;;  %p1703_p6 = scmp.ne.s32.totalorder %s2082_s7, %s1702_s29  ;;  %p2158_p8 = scmp.ne.s32.totalorder %s2146_s14, 0 }
  0x7e   : > { %v1548_v11 = vld [vmem:[%s1996_s23 + $0x4] ss:$8 sps:$4 sm:$0xff]   ;;  %v1541_v12 = vld [vmem:[#allocation5 + $0x10] sm:$0xff]   ;;  %v1570_v17 = vld [vmem:[#allocation8 + $0x78] sm:$0xff]   ;;  %s1788_s22 = smov [#allocation9]  }
  0x7f   : > { %570 = vmatprep.mubr.bf16.mxu0 %v1548_v11  ;;  %v1542_v13 = vld [vmem:[#allocation5 + $0x48] sm:$0xff]   ;;  %v1544_v15 = vld [vmem:[#allocation5 + $0x40] sm:$0xff]   ;;  %v1571_v19 = vld [vmem:[#allocation8 + $0x38] sm:$0xff]   ;;  %1388 = vmatprep.subr.bf16.mxu1 %v1570_v17  ;;  %p1704_p12 = pnand %p1703_p6, %p2158_p8  ;;  %s1706_s16 = sshll.u32 %s1788_s22, 4  ;;  %s1707_s16 = int_to_ptr.vmem [resolvable:$false] %s1706_s16 }
  0x80   : > { %1327 = vmatpush3.bf16.msra.mxu0 %v1533_v3  ;;  %v1543_v14 = vld [vmem:[#allocation5 + $0x8] sm:$0xff]   ;;  %v1545_v16 = vld [vmem:[#allocation5] sm:$0xff]   ;;  %v1549_v20 = vld [vmem:[%s1996_s23 + $0x14] ss:$8 sps:$4 sm:$0xff]   ;;  %1389 = vmatpush3.bf16.msra.mxu1 %v1571_v19  ;;  %s1708_s12 = scalar_lea.vmem %s1707_s16, 2048  ;;  %p1709_p0 = scmp.lt.s32.totalorder %s2082_s7, %s1707_s16 }
  0x81   : > { %1328 = vmatprep.subr.bf16.mxu0 %v1534_v4  ;;  %v1546_v18 = vld [vmem:[%s1996_s23] ss:$8 sps:$4 sm:$0xff]   ;;  %v1572_v21 = vld [vmem:[#allocation8 + $0x70] sm:$0xff]   ;;  %v1552_v28 = vld [vmem:[%s1996_s23 + $0x24] ss:$8 sps:$4 sm:$0xff]   ;;  %p1705_p7 = pneg %p1704_p12  ;;  %p1710_p5 = scmp.lt.s32.totalorder %s1708_s12, %s1702_s29 }
  0x82   : > { %v1573_v22 = vld [vmem:[#allocation8 + $0x30] sm:$0xff]   ;;  %1390 = vmatprep.subr.bf16.mxu1 %v1572_v21  ;;  %v1574_v23 = vld [vmem:[#allocation8 + $0x68] sm:$0xff]   ;;  %v1576_v25 = vld [vmem:[#allocation8 + $0x60] sm:$0xff]  }
  0x83   : > { %v1575_v24 = vld [vmem:[#allocation8 + $0x28] sm:$0xff]   ;;  %v1551_v26 = vld [vmem:[%s1996_s23 + $0x10] ss:$8 sps:$4 sm:$0xff]   ;;  %v1577_v27 = vld [vmem:[#allocation8 + $0x20] sm:$0xff]   ;;  %p1711_p9 = por %p1710_p5, %p1709_p0 }
  0x84   : > { %1329 = vmatpush3.bf16.msra.mxu0 %v1535_v5  ;;  %1391 = vmatpush3.bf16.msra.mxu1 %v1573_v22  ;;  %v1578_v29 = vld [vmem:[#allocation8 + $0x58] sm:$0xff]   ;;  %v1580_v31 = vld [vmem:[#allocation8 + $0x50] sm:$0xff]   ;;  %v1554_v32 = vld [vmem:[%s1996_s23 + $0x20] ss:$8 sps:$4 sm:$0xff]  }
  0x85   : > { %1330 = vmatprep.subr.bf16.mxu0 %v1536_v6  ;;  %1392 = vmatprep.subr.bf16.mxu1 %v1574_v23  ;;  %v1579_v30 = vld [vmem:[#allocation8 + $0x18] sm:$0xff]   ;;  %v1558_v35 = vld [vmem:[%s1996_s23 + $0x44] ss:$8 sps:$4 sm:$0xff]   ;;  %v1560_v36 = vld [vmem:[%s1996_s23 + $0x40] ss:$8 sps:$4 sm:$0xff]   ;;  %p1712_p13 = pnand %p1711_p9, %p1705_p7 }
  0x86   : > { %v1555_v33 = vld [vmem:[%s1996_s23 + $0x34] ss:$8 sps:$4 sm:$0xff]   ;;  %v1557_v34 = vld [vmem:[%s1996_s23 + $0x30] ss:$8 sps:$4 sm:$0xff]   ;;  %v1564_v39 = vld [vmem:[%s1996_s23 + $0x64] ss:$8 sps:$4 sm:$0xff]  }
  0x87   : > { %v1561_v37 = vld [vmem:[%s1996_s23 + $0x54] ss:$8 sps:$4 sm:$0xff]   ;;  %v1563_v38 = vld [vmem:[%s1996_s23 + $0x50] ss:$8 sps:$4 sm:$0xff]   ;;  %v1566_v40 = vld [vmem:[%s1996_s23 + $0x60] ss:$8 sps:$4 sm:$0xff]  }
  0x88   : > { %1331 = vmatpush3.bf16.msra.mxu0 %v1537_v7  ;;  %1393 = vmatpush3.bf16.msra.mxu1 %v1575_v24  ;;  %v1567_v41 = vld [vmem:[%s1996_s23 + $0x74] ss:$8 sps:$4 sm:$0xff]   ;;  %v1569_v42 = vld [vmem:[%s1996_s23 + $0x70] ss:$8 sps:$4 sm:$0xff]   ;;  %v1582_v44 = vld [vmem:[#allocation8 + $0x48] sm:$0xff]  }
  0x89   : > { %1332 = vmatprep.subr.bf16.mxu0 %v1538_v8  ;;  %1394 = vmatprep.subr.bf16.mxu1 %v1576_v25  ;;  %v1581_v43 = vld [vmem:[#allocation8 + $0x10] sm:$0xff]   ;;  %v1583_v45 = vld [vmem:[#allocation8 + $0x8] sm:$0xff]   ;;  %v1584_v46 = vld [vmem:[#allocation8 + $0x40] sm:$0xff]  }
  0x8a   : > { %v1585_v47 = vld [vmem:[#allocation8] sm:$0xff]   ;;  %v1587_v56 = vld [vmem:[%s2009_s9 + $0x8] sm:$0xff]   ;;  %v1588_v0 = vld [vmem:[%s2009_s9 + $0x10] sm:$0xff]  }
  0x8b   : > { %v1586_v48 = vld [vmem:[%s2009_s9] sm:$0xff]   ;;  %v1589_v8 = vld [vmem:[%s2009_s9 + $0x18] sm:$0xff]   ;;  %v1591_v24 = vld [vmem:[%s2009_s9 + $0x28] sm:$0xff]  }
  0x8c   : > { %1333 = vmatpush3.bf16.msra.mxu0 %v1539_v9  ;;  %1395 = vmatpush3.bf16.msra.mxu1 %v1577_v27 }
  0x8d   : > { %1334 = vmatprep.subr.bf16.mxu0 %v1540_v10  ;;  %1396 = vmatprep.subr.bf16.mxu1 %v1578_v29 }
  0x8e   : > { %874 = vmatprep.mubr.bf16.mxu1 %v1586_v48 }
  0x90   : > { %1335 = vmatpush3.bf16.msra.mxu0 %v1541_v12  ;;  %1397 = vmatpush3.bf16.msra.mxu1 %v1579_v30 }
  0x91   : > { %1336 = vmatprep.subr.bf16.mxu0 %v1542_v13  ;;  %1398 = vmatprep.subr.bf16.mxu1 %v1580_v31 }
  0x94   : > { %1337 = vmatpush3.bf16.msra.mxu0 %v1543_v14  ;;  %1399 = vmatpush3.bf16.msra.mxu1 %v1581_v43 }
  0x95   : > { %1338 = vmatprep.subr.bf16.mxu0 %v1544_v15  ;;  %1400 = vmatprep.subr.bf16.mxu1 %v1582_v44 }
  0x98   : > { %1339 = vmatpush3.bf16.msra.mxu0 %v1545_v16  ;;  %1401 = vmatpush3.bf16.msra.mxu1 %v1583_v45  ;;  %v1590_v16 = vld [vmem:[%s2009_s9 + $0x20] sm:$0xff]  }
  0x99   : > { %1402 = vmatprep.subr.bf16.mxu1 %v1584_v46 }
  0x9b   : > { %571 = vmatmul.mubr.bf16.vlgmr.msra.gmra.mxu0 %v1546_v18 }
  0x9c   : > { %578 = vmatprep.mubr.bf16.mxu0 %v1549_v20  ;;  %1403 = vmatpush3.bf16.msra.mxu1 %v1585_v47 }
  0xa3   : > { %579 = vmatmul.mubr.bf16.gmra.mxu0 %v1551_v26 }
  0xa4   : > { %586 = vmatprep.mubr.bf16.mxu0 %v1552_v28 }
  0xab   : > { %587 = vmatmul.mubr.bf16.gmra.mxu0 %v1554_v32  ;;  %v1592_v32 = vld [vmem:[%s2009_s9 + $0x30] sm:$0xff]  }
  0xac   : > { %594 = vmatprep.mubr.bf16.mxu0 %v1555_v33 }
  0xb3   : > { %595 = vmatmul.mubr.bf16.gmra.mxu0 %v1557_v34 }
  0xb4   : > { %602 = vmatprep.mubr.bf16.mxu0 %v1558_v35 }
  0xbb   : > { %603 = vmatmul.mubr.bf16.gmra.mxu0 %v1560_v36 }
  0xbc   : > { %610 = vmatprep.mubr.bf16.mxu0 %v1561_v37 }
  0xc3   : > { %611 = vmatmul.mubr.bf16.gmra.mxu0 %v1563_v38 }
  0xc4   : > { %618 = vmatprep.mubr.bf16.mxu0 %v1564_v39 }
  0xcb   : > { %619 = vmatmul.mubr.bf16.gmra.mxu0 %v1566_v40  ;;  %v1593_v40 = vld [vmem:[%s2009_s9 + $0x38] sm:$0xff]  }
  0xcc   : > { %626 = vmatprep.mubr.bf16.mxu0 %v1567_v41 }
  0xd3   : > { %627 = vmatmul.mubr.bf16.gmra.mxu0 %v1569_v42 }
 0x15b   : > { %v1340_v49 = vpop.f32.mrf.mxu0 }
 0x15d   : > { %v1341_v50 = vpop.f32.mrf.mxu0 }
 0x15e   : > { %v1342_v53 = vadd.f32 %v1341_v50, %v1340_v49 }
 0x15f   : > { %v1343_v51 = vpop.f32.mrf.mxu0 }
 0x161   : > { %v1344_v52 = vpop.f32.mrf.mxu0 }
 0x162   : > { %v1345_v54 = vadd.f32 %v1344_v52, %v1343_v51  ;;  %v2046_v51 = vld [vmem:[%s2130_s4] ss:$0 sm:$0xff] }
 0x163   : > { %v1346_v55 = vpop.f32.mrf.mxu0 }
 0x164   : > { %v635_v57 = vpack.c.bf16 %v1345_v54, %v1342_v53 }
 0x165   : > { %v1347_v58 = vpop.f32.mrf.mxu0 }
 0x166   : > { %875 = vmatmul.mubr.bf16.vlgmr.msra.gmra.mxu1 %v635_v57  ;;  %v1348_v61 = vadd.f32 %v1347_v58, %v1346_v55 }
 0x167   : > { %v1349_v59 = vpop.f32.mrf.mxu0  ;;  %882 = vmatprep.mubr.bf16.mxu1 %v1587_v56 }
 0x169   : > { %v1350_v60 = vpop.f32.mrf.mxu0 }
 0x16a   : > { %v1351_v62 = vadd.f32 %v1350_v60, %v1349_v59 }
 0x16b   : > { %v1352_v63 = vpop.f32.mrf.mxu0 }
 0x16c   : > { %v636_v1 = vpack.c.bf16 %v1351_v62, %v1348_v61 }
 0x16d   : > { %v1353_v2 = vpop.f32.mrf.mxu0 }
 0x16e   : > { %883 = vmatmul.mubr.bf16.gmra.mxu1 %v636_v1  ;;  %v1354_v5 = vadd.f32 %v1353_v2, %v1352_v63 }
 0x16f   : > { %v1355_v3 = vpop.f32.mrf.mxu0  ;;  %890 = vmatprep.mubr.bf16.mxu1 %v1588_v0 }
 0x171   : > { %v1356_v4 = vpop.f32.mrf.mxu0 }
 0x172   : > { %v1357_v6 = vadd.f32 %v1356_v4, %v1355_v3 }
 0x173   : > { %v1358_v7 = vpop.f32.mrf.mxu0 }
 0x174   : > { %v637_v9 = vpack.c.bf16 %v1357_v6, %v1354_v5 }
 0x175   : > { %v1359_v10 = vpop.f32.mrf.mxu0 }
 0x176   : > { %891 = vmatmul.mubr.bf16.gmra.mxu1 %v637_v9  ;;  %v1360_v13 = vadd.f32 %v1359_v10, %v1358_v7 }
 0x177   : > { %v1361_v11 = vpop.f32.mrf.mxu0  ;;  %898 = vmatprep.mubr.bf16.mxu1 %v1589_v8 }
 0x179   : > { %v1362_v12 = vpop.f32.mrf.mxu0 }
 0x17a   : > { %v1363_v14 = vadd.f32 %v1362_v12, %v1361_v11 }
 0x17b   : > { %v1364_v15 = vpop.f32.mrf.mxu0 }
 0x17c   : > { %v638_v17 = vpack.c.bf16 %v1363_v14, %v1360_v13 }
 0x17d   : > { %v1365_v18 = vpop.f32.mrf.mxu0 }
 0x17e   : > { %899 = vmatmul.mubr.bf16.gmra.mxu1 %v638_v17  ;;  %v1366_v21 = vadd.f32 %v1365_v18, %v1364_v15 }
 0x17f   : > { %v1367_v19 = vpop.f32.mrf.mxu0  ;;  %906 = vmatprep.mubr.bf16.mxu1 %v1590_v16 }
 0x181   : > { %v1368_v20 = vpop.f32.mrf.mxu0 }
 0x182   : > { %v1369_v22 = vadd.f32 %v1368_v20, %v1367_v19 }
 0x183   : > { %v1370_v23 = vpop.f32.mrf.mxu0 }
 0x184   : > { %v639_v25 = vpack.c.bf16 %v1369_v22, %v1366_v21 }
 0x185   : > { %v1371_v26 = vpop.f32.mrf.mxu0 }
 0x186   : > { %907 = vmatmul.mubr.bf16.gmra.mxu1 %v639_v25  ;;  %v1372_v29 = vadd.f32 %v1371_v26, %v1370_v23 }
 0x187   : > { %v1373_v27 = vpop.f32.mrf.mxu0  ;;  %914 = vmatprep.mubr.bf16.mxu1 %v1591_v24 }
 0x189   : > { %v1374_v28 = vpop.f32.mrf.mxu0 }
 0x18a   : > { %v1375_v30 = vadd.f32 %v1374_v28, %v1373_v27 }
 0x18b   : > { %v1376_v31 = vpop.f32.mrf.mxu0 }
 0x18c   : > { %v640_v33 = vpack.c.bf16 %v1375_v30, %v1372_v29 }
 0x18d   : > { %v1377_v34 = vpop.f32.mrf.mxu0 }
 0x18e   : > { %915 = vmatmul.mubr.bf16.gmra.mxu1 %v640_v33  ;;  %v1378_v37 = vadd.f32 %v1377_v34, %v1376_v31 }
 0x18f   : > { %v1379_v35 = vpop.f32.mrf.mxu0  ;;  %922 = vmatprep.mubr.bf16.mxu1 %v1592_v32 }
 0x191   : > { %v1380_v36 = vpop.f32.mrf.mxu0 }
 0x192   : > { %v1381_v38 = vadd.f32 %v1380_v36, %v1379_v35 }
 0x193   : > { %v1382_v39 = vpop.f32.mrf.mxu0 }
 0x194   : > { %v641_v41 = vpack.c.bf16 %v1381_v38, %v1378_v37 }
 0x195   : > { %v1383_v42 = vpop.f32.mrf.mxu0 }
 0x196   : > { %923 = vmatmul.mubr.bf16.gmra.mxu1 %v641_v41  ;;  %v1384_v45 = vadd.f32 %v1383_v42, %v1382_v39 }
 0x197   : > { %v1385_v43 = vpop.f32.mrf.mxu0  ;;  %930 = vmatprep.mubr.bf16.mxu1 %v1593_v40 }
 0x199   : > { %v1386_v44 = vpop.f32.mrf.mxu0 }
 0x19a   : > { %v1387_v46 = vadd.f32 %v1386_v44, %v1385_v43 }
 0x19c   : > { %v642_v47 = vpack.c.bf16 %v1387_v46, %v1384_v45 }
 0x19e   : > { %931 = vmatmul.mubr.bf16.gmra.mxu1 %v642_v47 }
 0x226   : > { %v1404_v48 = vpop.f32.mrf.mxu1 }
 0x228   : > { %v1405_v49 = vpop.f32.mrf.mxu1 }
 0x229   : > { %v1406_v50 = vadd.f32 %v1405_v49, %v1404_v48 }
 0x22a   : > { %v1407_v52 = vpop.f32.mrf.mxu1 }
 0x22b   : > { %v877_v54 = vadd.f32 %v1406_v50, %v2046_v51 }
 0x22c   : > { %v1408_v53 = vpop.f32.mrf.mxu1 }
 0x22d   : > { %v1409_v55 = vadd.f32 %v1408_v53, %v1407_v52  ;;  %v939_v59 = vmax.f32 %v877_v54, 0.0 }
 0x22e   : > { %v1410_v56 = vpop.f32.mrf.mxu1 }
 0x22f   : > { %v880_v57 = vadd.f32 %v1409_v55, %v2046_v51 }
 0x230   : > { %v1411_v58 = vpop.f32.mrf.mxu1 }
 0x231   : > { %v940_v60 = vmax.f32 %v880_v57, 0.0  ;;  %v1412_v61 = vadd.f32 %v1411_v58, %v1410_v56 }
 0x232   : > { %v1413_v62 = vpop.f32.mrf.mxu1 }
 0x233   : > { %v1280_v63 = vpack.c.bf16 %v940_v60, %v939_v59  ;;  %v885_v1 = vadd.f32 %v1412_v61, %v2046_v51 }
 0x234   : > { %v1414_v0 = vpop.f32.mrf.mxu1 }
 0x235   : > { %1281 = vst [vmem:[%s2052_s6] sm:$0xff] %v1280_v63   ;;  %v1415_v2 = vadd.f32 %v1414_v0, %v1413_v62  ;;  %v941_v6 = vmax.f32 %v885_v1, 0.0 }
 0x236   : > { %v1416_v3 = vpop.f32.mrf.mxu1 }
 0x237   : > { %v888_v4 = vadd.f32 %v1415_v2, %v2046_v51 }
 0x238   : > { %v1417_v5 = vpop.f32.mrf.mxu1 }
 0x239   : > { %v942_v7 = vmax.f32 %v888_v4, 0.0  ;;  %v1418_v8 = vadd.f32 %v1417_v5, %v1416_v3 }
 0x23a   : > { %v1419_v9 = vpop.f32.mrf.mxu1 }
 0x23b   : > { %v1285_v10 = vpack.c.bf16 %v942_v7, %v941_v6  ;;  %v893_v12 = vadd.f32 %v1418_v8, %v2046_v51 }
 0x23c   : > { %v1420_v11 = vpop.f32.mrf.mxu1 }
 0x23d   : > { %1317 = vst [vmem:[%s2052_s6 + $0x8] sm:$0xff] %v1285_v10   ;;  %v1421_v13 = vadd.f32 %v1420_v11, %v1419_v9  ;;  %v943_v17 = vmax.f32 %v893_v12, 0.0 }
 0x23e   : > { %v1422_v14 = vpop.f32.mrf.mxu1 }
 0x23f   : > { %v896_v15 = vadd.f32 %v1421_v13, %v2046_v51 }
 0x240   : > { %v1423_v16 = vpop.f32.mrf.mxu1 }
 0x241   : > { %v944_v18 = vmax.f32 %v896_v15, 0.0  ;;  %v1424_v19 = vadd.f32 %v1423_v16, %v1422_v14 }
 0x242   : > { %v1425_v20 = vpop.f32.mrf.mxu1 }
 0x243   : > { %v1290_v21 = vpack.c.bf16 %v944_v18, %v943_v17  ;;  %v901_v23 = vadd.f32 %v1424_v19, %v2046_v51 }
 0x244   : > { %v1426_v22 = vpop.f32.mrf.mxu1 }
 0x245   : > { %1318 = vst [vmem:[%s2052_s6 + $0x10] sm:$0xff] %v1290_v21   ;;  %v1427_v24 = vadd.f32 %v1426_v22, %v1425_v20  ;;  %v945_v28 = vmax.f32 %v901_v23, 0.0 }
 0x246   : > { %v1428_v25 = vpop.f32.mrf.mxu1 }
 0x247   : > { %v904_v26 = vadd.f32 %v1427_v24, %v2046_v51 }
 0x248   : > { %v1429_v27 = vpop.f32.mrf.mxu1 }
 0x249   : > { %v946_v29 = vmax.f32 %v904_v26, 0.0  ;;  %v1430_v30 = vadd.f32 %v1429_v27, %v1428_v25 }
 0x24a   : > { %v1431_v31 = vpop.f32.mrf.mxu1 }
 0x24b   : > { %v1295_v32 = vpack.c.bf16 %v946_v29, %v945_v28  ;;  %v909_v34 = vadd.f32 %v1430_v30, %v2046_v51 }
 0x24c   : > { %v1432_v33 = vpop.f32.mrf.mxu1 }
 0x24d   : > { %1319 = vst [vmem:[%s2052_s6 + $0x18] sm:$0xff] %v1295_v32   ;;  %v1433_v35 = vadd.f32 %v1432_v33, %v1431_v31  ;;  %v947_v39 = vmax.f32 %v909_v34, 0.0 }
 0x24e   : > { %v1434_v36 = vpop.f32.mrf.mxu1 }
 0x24f   : > { %v912_v37 = vadd.f32 %v1433_v35, %v2046_v51 }
 0x250   : > { %v1435_v38 = vpop.f32.mrf.mxu1 }
 0x251   : > { %v948_v40 = vmax.f32 %v912_v37, 0.0  ;;  %v1436_v41 = vadd.f32 %v1435_v38, %v1434_v36 }
 0x252   : > { %v1437_v42 = vpop.f32.mrf.mxu1 }
 0x253   : > { %v1300_v43 = vpack.c.bf16 %v948_v40, %v947_v39  ;;  %v917_v45 = vadd.f32 %v1436_v41, %v2046_v51 }
 0x254   : > { %v1438_v44 = vpop.f32.mrf.mxu1 }
 0x255   : > { %1320 = vst [vmem:[%s2052_s6 + $0x20] sm:$0xff] %v1300_v43   ;;  %v1439_v46 = vadd.f32 %v1438_v44, %v1437_v42  ;;  %v949_v50 = vmax.f32 %v917_v45, 0.0 }
 0x256   : > { %v1440_v47 = vpop.f32.mrf.mxu1 }
 0x257   : > { %v920_v48 = vadd.f32 %v1439_v46, %v2046_v51 }
 0x258   : > { %v1441_v49 = vpop.f32.mrf.mxu1 }
 0x259   : > { %v950_v52 = vmax.f32 %v920_v48, 0.0  ;;  %v1442_v53 = vadd.f32 %v1441_v49, %v1440_v47 }
 0x25a   : > { %v1443_v54 = vpop.f32.mrf.mxu1 }
 0x25b   : > { %v1305_v55 = vpack.c.bf16 %v950_v52, %v949_v50  ;;  %v925_v57 = vadd.f32 %v1442_v53, %v2046_v51 }
 0x25c   : > { %v1444_v56 = vpop.f32.mrf.mxu1 }
 0x25d   : > { %1321 = vst [vmem:[%s2052_s6 + $0x28] sm:$0xff] %v1305_v55   ;;  %v1445_v58 = vadd.f32 %v1444_v56, %v1443_v54  ;;  %v951_v62 = vmax.f32 %v925_v57, 0.0 }
 0x25e   : > { %v1446_v59 = vpop.f32.mrf.mxu1 }
 0x25f   : > { %v928_v60 = vadd.f32 %v1445_v58, %v2046_v51 }
 0x260   : > { %v1447_v61 = vpop.f32.mrf.mxu1 }
 0x261   : > { %v952_v63 = vmax.f32 %v928_v60, 0.0  ;;  %v1448_v0 = vadd.f32 %v1447_v61, %v1446_v59 }
 0x262   : > { %v1449_v1 = vpop.f32.mrf.mxu1 }
 0x263   : > { %v1310_v2 = vpack.c.bf16 %v952_v63, %v951_v62  ;;  %v933_v4 = vadd.f32 %v1448_v0, %v2046_v51 }
 0x264   : > { %v1450_v3 = vpop.f32.mrf.mxu1 }
 0x265   : > { %1322 = vst [vmem:[%s2052_s6 + $0x30] sm:$0xff] %v1310_v2   ;;  %v1451_v5 = vadd.f32 %v1450_v3, %v1449_v1  ;;  %v953_v7 = vmax.f32 %v933_v4, 0.0 }
 0x267   : > { %v936_v6 = vadd.f32 %v1451_v5, %v2046_v51 }
 0x269   : > { %v954_v8 = vmax.f32 %v936_v6, 0.0 }
 0x26b   : > { %v1315_v9 = vpack.c.bf16 %v954_v8, %v953_v7 }
 0x26d   : > { %1323 = vst [vmem:[%s2052_s6 + $0x38] sm:$0xff] %v1315_v9  }
 0x26e   : > { %1715 = shalt.err (!%p1712_p13)
}
 0x26f   : > { %s1716_s0 = scalar_lea.hbm %s2080_s10, 1024  ;;  %s1720_s9 = scalar_lea.hbm %s2131_s5, 2048 }
 0x270   : > { %p1717_p10 = scmp.ne.s32.totalorder %s2080_s10, %s1716_s0  ;;  %p1721_p11 = scmp.lt.s32.totalorder %s2080_s10, %s2131_s5 }
 0x271   : > { %p1722_p1 = scmp.lt.s32.totalorder %s1720_s9, %s1716_s0 }
 0x272   : > { %p1718_p3 = pnand %p1717_p10, %p2158_p8 }
 0x273   : > { %p1723_p4 = por %p1722_p1, %p1721_p11 }
 0x274   : > { %p1719_p2 = pneg %p1718_p3 }
 0x276   : > { %p1724_p6 = pnand %p1723_p4, %p1719_p2 }
 0x278   : > { %1727 = shalt.err (!%p1724_p6)
}
 0x279   : > { %s1789_s6 = smov 64   ;;  %s1790_s28 = smov 4  }
 0x27a   : > { %1464 = dma.vmem_to_hbm [thread:$0]  (%p2158_p8), %s2082_s7, 1024, %s2080_s10, %s1036_s27, %s1789_s6, %s1789_s6, %s1790_s28  }
 0x27b PF: > { %s1064_s8 = sand.u32 1, %s1766_s18   ;;  %p2159_p12 = scmp.ne.s32.totalorder %s2143_s25, 0 }
 0x27c   : > { %p2160_p7 = scmp.ge.s32.totalorder %s1778_s21, 2  ;;  %s1065_s15 = scalar_lea.sflag [#allocation4], %s1064_s8 }
 0x27e   : > { %p1481_p0 = pnand %p2160_p7, %p2159_p12 }
 0x280   : > { %p1482_p5 = pneg %p1481_p0 }
 0x282   : > { %1761 = dma.done.wait (%p1482_p5), %s1065_s15, 1024  }
 0x283   : > { %1763 = vsyncadd (%p1482_p5), %s1065_s15, 4294966272  ;;  %p19_p9 = scmp.ge.s32.totalorder %s1875_s30, 4   ;;  %s2161_s18 = smov %s1770_s19 }
 0x284   : > { %s2162_s19 = smov %s1774_s20  ;;  %s2163_s20 = smov %s1898_s13 }
 0x285   : > { %s2164_s21 = smov %s1875_s30  ;;  %21 = sbr.rel (!%p19_p9) target bundleno = 8 (0x8), region = 104 }
 0x28a   :  { %1070 = vsyncpa [#allocation3], 1 }
 0x28b   :  { %1072 = vsyncpa [#allocation3 + $0x1], 1 }
 0x28c   :  { %1073 = vsyncpa [#allocation6], 1 }
 0x28d   :  { %1074 = vsyncpa [#allocation4], 1 }
 0x28e   :  { %1076 = vsyncpa [#allocation4 + $0x1], 1 }

</bundles_post_ra>
